<compile_context>
chip_gen: v6e
topology: v6e:2x2x1
jax: 0.10.0
libtpu: 0.0.40
codegen_flags: <defaults>
</compile_context>

<pallas_src>
import math
import functools

import jax
import jax.numpy as jnp
from jax import lax
from jax.experimental import pallas as pl
from jax.experimental.pallas import tpu as pltpu


D_MODEL = 32
NUM_HEADS = 8
SEQ = 8
BATCH = 2
EPS = 1e-6
_BIG = 1e30   # additive-mask magnitude (exp underflows to exactly 0 in f32)


def _gelu_exact(x):
    # nn.GELU() default: exact erf-based GELU
    return 0.5 * x * (1.0 + lax.erf(x * (1.0 / math.sqrt(2.0))))


def adapter_block_kernel(
    x_ref,            # (rows, D) f32,  rows = batch_block * seq
    n1w_ref,          # (1, D)  f32
    wqkv_ref,         # (D, 3D) bf16   columns [0:D]=Q, [D:2D]=K, [2D:3D]=V
    bqkv_ref,         # (1, 3D) f32
    wo_ref, bo_ref,   # (D, D) bf16, (1, D) f32
    n2w_ref,          # (1, D)  f32
    w1_ref, b1_ref,   # (D, 4D) bf16, (1, 4D) f32
    w2_ref, b2_ref,   # (4D, D) bf16, (1, D) f32
    rep_ref,          # (H*rows, rows)    0/1 replication matrix (head-major)
    hmask_ref,        # (H*rows, D)       0/1 head-lane mask
    nmask_ref,        # (rows, H*rows)    1.0 at cross-batch (invalid) score positions
    bones_ref,        # (H*rows, H*rows)  per-(head, batch) blocks of ones
    o_ref,            # (rows, D) f32
    *, num_heads,
):
    f32 = jnp.float32
    bf16 = jnp.bfloat16

    x = x_ref[...]                                            # (rows, D) f32
    _, D = x.shape
    hd = D // num_heads
    scale = 1.0 / math.sqrt(hd)

    # ---- RMSNorm 1 ----
    # Matches the PyTorch module: rms = sqrt(||x||^2 + eps); the .mean(-1) in the
    # reference acts on a size-1 dim, so it is SUM of squares, not mean.
    inv1 = lax.rsqrt(jnp.sum(x * x, axis=-1, keepdims=True) + EPS)
    xn = n1w_ref[...] * x * inv1

    # ---- fused QKV projection: one (rows,D) x (D,3D) MXU matmul, bf16 operands ----
    qkv = jnp.dot(xn.astype(bf16), wqkv_ref[...],
                  preferred_element_type=f32) + bqkv_ref[...]
    q = qkv[:, :D] * scale                                    # fold 1/sqrt(head_dim) into q
    kv = qkv[:, D:]                                           # (rows, 2D)  [K | V]

    # ---- head/batch expansion on the MXU ----
    # kv_exp[r] = kv[r % rows] for r = head*rows + row (head-major ordering), via a
    # constant 0/1 replication matrix; then zero all lanes outside head (r // rows).
    hmask = hmask_ref[...]
    kv_exp = jnp.dot(rep_ref[...], kv, preferred_element_type=f32)   # (H*rows, 2D)
    k_exp = kv_exp[:, :D] * hmask
    v_exp = kv_exp[:, D:] * hmask

    # ---- block-masked attention: one score, one denominator, one PV matmul ----
    s = lax.dot_general(q, k_exp, (((1,), (1,)), ((), ())),
                        preferred_element_type=f32)           # (rows, H*rows)
    nmask = nmask_ref[...]
    s = s - nmask * _BIG                                      # kill cross-batch positions
    m = jnp.max(s, axis=-1, keepdims=True)                    # row-global max (exact shift)
    p = jnp.exp(s - m)                                        # masked entries -> exactly 0
    # Per-(head,batch) block sums of p.  '+ nmask' pins cross-batch denominators at 1
    # (their numerators are exactly 0), so the reciprocal never sees 0.
    den = jnp.dot(p, bones_ref[...], preferred_element_type=f32) + nmask
    inv_den = pl.reciprocal(den, approx=True)                 # EUP slot
    inv_den = inv_den * (2.0 - den * inv_den)                 # one Newton step -> ~f32 exact
    pn = p * inv_den
    # PV result is already head-concatenated along lanes: (rows, D).
    attn = jnp.dot(pn.astype(bf16), v_exp.astype(bf16), preferred_element_type=f32)
    attn = jnp.dot(attn.astype(bf16), wo_ref[...],
                   preferred_element_type=f32) + bo_ref[...]

    # ---- residual 1 (dropout1 = identity in eval) ----
    x1 = x + attn

    # ---- RMSNorm 2 + MLP ----
    inv2 = lax.rsqrt(jnp.sum(x1 * x1, axis=-1, keepdims=True) + EPS)
    x2n = n2w_ref[...] * x1 * inv2
    h = jnp.dot(x2n.astype(bf16), w1_ref[...], preferred_element_type=f32) + b1_ref[...]
    h = _gelu_exact(h)
    mlp = jnp.dot(h.astype(bf16), w2_ref[...], preferred_element_type=f32) + b2_ref[...]

    # ---- residual 2 ----
    o_ref[...] = x1 + mlp


def _attention_masks(batch_block, seq, num_heads, d_model):
    """Constant 0/1 masks for the head-major, block-structured attention expansion."""
    rows = batch_block * seq
    hbs = num_heads * rows
    hd = d_model // num_heads
    r = jnp.arange(hbs)
    # replication: expanded row r copies key/value row (r % rows)
    rep = (r[:, None] % rows == jnp.arange(rows)[None, :]).astype(jnp.float32)
    # head-lane mask: expanded row r belongs to head (r // rows)
    hmask = ((r[:, None] // rows) ==
             (jnp.arange(d_model)[None, :] // hd)).astype(jnp.float32)
    # cross-batch mask on the scores (1.0 where query batch != key batch)
    q_batch = jnp.arange(rows)[:, None] // seq
    k_batch = (r[None, :] % rows) // seq
    nmask = (q_batch != k_batch).astype(jnp.float32)
    # per-(head, batch) blocks of ones for the softmax denominators
    bones = ((r[:, None] // seq) == (r[None, :] // seq)).astype(jnp.float32)
    return rep, hmask, nmask, bones


def attention_adapter_block(x, params, *, num_heads=NUM_HEADS, batch_block=None):
    B, S, D = x.shape
    if batch_block is None:
        # Small blocks keep the block-masked expansion waste (~batch_block x on the
        # score/denominator matmuls) bounded while still fusing several sequences.
        batch_block = next(bb for bb in (4, 2, 1) if B % bb == 0)
    assert B % batch_block == 0, "batch must be divisible by batch_block"
    rows = batch_block * S
    n_blocks = B // batch_block

    x2 = x.reshape(B * S, D)   # fold batch*seq into the matmul M dim (free, outside kernel)
    rep, hmask, nmask, bones = _attention_masks(batch_block, S, num_heads, D)

    # MXU weight operands pre-cast to bf16 once (halves resident weight bytes, removes
    # per-step in-kernel casts); biases / norm weights / masks stay f32.
    wqkv = params["wqkv_t"].astype(jnp.bfloat16)
    wo = params["wo_t"].astype(jnp.bfloat16)
    w1 = params["w1_t"].astype(jnp.bfloat16)
    w2 = params["w2_t"].astype(jnp.bfloat16)

    kernel = functools.partial(adapter_block_kernel, num_heads=num_heads)

    def resident(a):
        # Full-array block with a constant index_map: stays VMEM-resident across steps.
        return pl.BlockSpec(a.shape, lambda i: (0,) * a.ndim)

    stream = pl.BlockSpec((rows, D), lambda i: (i, 0))

    consts = (params["norm1_w"], wqkv, params["bqkv"], wo, params["bo"],
              params["norm2_w"], w1, params["b1"], w2, params["b2"],
              rep, hmask, nmask, bones)

    out2 = pl.pallas_call(
        kernel,
        out_shape=jax.ShapeDtypeStruct((B * S, D), jnp.float32),
        grid=(n_blocks,),
        in_specs=[stream] + [resident(a) for a in consts],
        out_specs=stream,
        compiler_params=pltpu.CompilerParams(
            # Row-block axis is embarrassingly parallel -> lets v7x split the slab
            # across its two TensorCores once there are >= 2 blocks; no-op on v5e/v6e.
            dimension_semantics=("parallel",),
            # ~150 KiB resident worst case here; well under every generation's budget
            # (incl. v7x's 64 MiB VMEM / 32 MiB scoped default).
            vmem_limit_bytes=16 * 1024 * 1024,
        ),
    )(x2, *consts)
    return out2.reshape(B, S, D)


def make_params(key, d_model=D_MODEL):
    D = d_model
    ks = jax.random.split(key, 8)
    scale = 0.05
    # torch nn.MultiheadAttention packed in_proj: rows [0:D]=Wq, [D:2D]=Wk, [2D:3D]=Wv, y = x @ W^T
    in_proj_w = scale * jax.random.normal(ks[0], (3 * D, D), jnp.float32)
    in_proj_b = scale * jax.random.normal(ks[1], (3 * D,), jnp.float32)
    out_w = scale * jax.random.normal(ks[2], (D, D), jnp.float32)
    out_b = scale * jax.random.normal(ks[3], (D,), jnp.float32)
    w1 = scale * jax.random.normal(ks[4], (4 * D, D), jnp.float32)
    b1 = scale * jax.random.normal(ks[5], (4 * D,), jnp.float32)
    w2 = scale * jax.random.normal(ks[6], (D, 4 * D), jnp.float32)
    b2 = scale * jax.random.normal(ks[7], (D,), jnp.float32)

    return {
        "norm1_w": jnp.ones((1, D), jnp.float32),
        "norm2_w": jnp.ones((1, D), jnp.float32),
        "wqkv_t": in_proj_w.T,             # (D, 3D): columns [0:D]=Q, [D:2D]=K, [2D:3D]=V
        "bqkv": in_proj_b[None, :],        # (1, 3D)
        "wo_t": out_w.T, "bo": out_b[None, :],
        "w1_t": w1.T, "b1": b1[None, :],
        "w2_t": w2.T, "b2": b2[None, :],
    }


def reference_forward(x, params, *, num_heads=NUM_HEADS):
    """Pure-JAX f32 reference matching the PyTorch forward (eval mode)."""
    B, S, D = x.shape
    hd = D // num_heads

    def rmsnorm(t, w):
        rms = jnp.sqrt(jnp.sum(t * t, axis=-1, keepdims=True) + EPS)
        return w * t / rms

    xn = rmsnorm(x, params["norm1_w"][0])
    qkv = xn @ params["wqkv_t"] + params["bqkv"][0]
    q, k, v = qkv[..., :D], qkv[..., D:2 * D], qkv[..., 2 * D:]

    def split(t):
        return t.reshape(B, S, num_heads, hd).transpose(0, 2, 1, 3)   # (B, H, S, hd)

    qh, kh, vh = split(q), split(k), split(v)
    s = jnp.einsum("bhqd,bhkd->bhqk", qh, kh) / math.sqrt(hd)
    p = jax.nn.softmax(s, axis=-1)
    o = jnp.einsum("bhqk,bhkd->bhqd", p, vh).transpose(0, 2, 1, 3).reshape(B, S, D)
    attn = o @ params["wo_t"] + params["bo"][0]

    x1 = x + attn
    x2n = rmsnorm(x1, params["norm2_w"][0])
    h = x2n @ params["w1_t"] + params["b1"][0]
    h = _gelu_exact(h)
    mlp = h @ params["w2_t"] + params["b2"][0]
    return x1 + mlp


if __name__ == "__main__":
    key = jax.random.PRNGKey(0)
    kx, kp, kx2 = jax.random.split(key, 3)
    params = make_params(kp)

    # Spec-sized test: batch=2, seq=8, d_model=32 (fully fused attention, grid=(1,)).
    x = jax.random.normal(kx, (BATCH, SEQ, D_MODEL), jnp.float32)
    out = jax.block_until_ready(attention_adapter_block(x, params))
    ref = reference_forward(x, params)
    assert out.shape == (BATCH, SEQ, D_MODEL)
    # bf16 MXU operands (f32 accumulate) set the error budget (~1e-3 abs at these
    # magnitudes); the softmax reciprocal is Newton-refined to ~f32 exact.
    assert jnp.allclose(out, ref, atol=2e-2, rtol=2e-2), (
        f"max abs diff {jnp.max(jnp.abs(out - ref))}"
    )

    # Larger-batch test: exercises the row-block grid (grid=(4,), resident weights,
    # "parallel" axis usable by v7x's second TensorCore).
    xb = jax.random.normal(kx2, (8, SEQ, D_MODEL), jnp.float32)
    outb = jax.block_until_ready(attention_adapter_block(xb, params, batch_block=2))
    refb = reference_forward(xb, params)
    assert jnp.allclose(outb, refb, atol=2e-2, rtol=2e-2), (
        f"max abs diff {jnp.max(jnp.abs(outb - refb))}"
    )

    print("KERNEL_OK")
</pallas_src>

<mosaic_0001>
module attributes {stable_mosaic.version = 11 : i64} {
  func.func @adapter_block_kernel(%arg0: i32, %arg1: memref<16x32xf32, #tpu.memory_space<vmem>>, %arg2: memref<1x32xf32, #tpu.memory_space<vmem>>, %arg3: memref<32x96xbf16, #tpu.memory_space<vmem>>, %arg4: memref<1x96xf32, #tpu.memory_space<vmem>>, %arg5: memref<32x32xbf16, #tpu.memory_space<vmem>>, %arg6: memref<1x32xf32, #tpu.memory_space<vmem>>, %arg7: memref<1x32xf32, #tpu.memory_space<vmem>>, %arg8: memref<32x128xbf16, #tpu.memory_space<vmem>>, %arg9: memref<1x128xf32, #tpu.memory_space<vmem>>, %arg10: memref<128x32xbf16, #tpu.memory_space<vmem>>, %arg11: memref<1x32xf32, #tpu.memory_space<vmem>>, %arg12: memref<128x16xf32, #tpu.memory_space<vmem>>, %arg13: memref<128x32xf32, #tpu.memory_space<vmem>>, %arg14: memref<16x128xf32, #tpu.memory_space<vmem>>, %arg15: memref<128x128xf32, #tpu.memory_space<vmem>>, %arg16: memref<16x32xf32, #tpu.memory_space<vmem>>) attributes {dimension_semantics = [#tpu.dimension_semantics<parallel>], iteration_bounds = array<i64: 1>, scalar_prefetch = 0 : i64, scratch_operands = 0 : i64, tpu.core_type = #tpu.core_type<tc>, window_params = [{transform_indices = @transform_0, window_bounds = array<i64: 16, 32>}, {pipeline_mode = #tpu.pipeline_mode<synchronous>, transform_indices = @transform_1, window_bounds = array<i64: 1, 32>}, {pipeline_mode = #tpu.pipeline_mode<synchronous>, transform_indices = @transform_2, window_bounds = array<i64: 32, 96>}, {pipeline_mode = #tpu.pipeline_mode<synchronous>, transform_indices = @transform_3, window_bounds = array<i64: 1, 96>}, {pipeline_mode = #tpu.pipeline_mode<synchronous>, transform_indices = @transform_4, window_bounds = array<i64: 32, 32>}, {pipeline_mode = #tpu.pipeline_mode<synchronous>, transform_indices = @transform_5, window_bounds = array<i64: 1, 32>}, {pipeline_mode = #tpu.pipeline_mode<synchronous>, transform_indices = @transform_6, window_bounds = array<i64: 1, 32>}, {pipeline_mode = #tpu.pipeline_mode<synchronous>, transform_indices = @transform_7, window_bounds = array<i64: 32, 128>}, {pipeline_mode = #tpu.pipeline_mode<synchronous>, transform_indices = @transform_8, window_bounds = array<i64: 1, 128>}, {pipeline_mode = #tpu.pipeline_mode<synchronous>, transform_indices = @transform_9, window_bounds = array<i64: 128, 32>}, {pipeline_mode = #tpu.pipeline_mode<synchronous>, transform_indices = @transform_10, window_bounds = array<i64: 1, 32>}, {pipeline_mode = #tpu.pipeline_mode<synchronous>, transform_indices = @transform_11, window_bounds = array<i64: 128, 16>}, {pipeline_mode = #tpu.pipeline_mode<synchronous>, transform_indices = @transform_12, window_bounds = array<i64: 128, 32>}, {pipeline_mode = #tpu.pipeline_mode<synchronous>, transform_indices = @transform_13, window_bounds = array<i64: 16, 128>}, {pipeline_mode = #tpu.pipeline_mode<synchronous>, transform_indices = @transform_14, window_bounds = array<i64: 128, 128>}, {transform_indices = @transform_15, window_bounds = array<i64: 16, 32>}]} {
    %c0 = arith.constant 0 : index
    %c0_0 = arith.constant 0 : index
    %0 = vector.load %arg1[%c0, %c0_0] : memref<16x32xf32, #tpu.memory_space<vmem>>, vector<16x32xf32>
    %1 = arith.mulf %0, %0 : vector<16x32xf32>
    %cst = arith.constant dense<0.000000e+00> : vector<16xf32>
    %2 = vector.multi_reduction <add>, %1, %cst [1] : vector<16x32xf32> to vector<16xf32>
    %3 = vector.shape_cast %2 : vector<16xf32> to vector<16x1xf32>
    %cst_1 = arith.constant 9.99999997E-7 : f32
    %4 = vector.broadcast %cst_1 : f32 to vector<16x1xf32>
    %5 = arith.addf %3, %4 : vector<16x1xf32>
    %6 = math.rsqrt %5 : vector<16x1xf32>
    %c0_2 = arith.constant 0 : index
    %c0_3 = arith.constant 0 : index
    %7 = vector.load %arg2[%c0_2, %c0_3] : memref<1x32xf32, #tpu.memory_space<vmem>>, vector<1x32xf32>
    %8 = vector.broadcast %7 : vector<1x32xf32> to vector<16x32xf32>
    %9 = arith.mulf %8, %0 : vector<16x32xf32>
    %10 = vector.broadcast %6 : vector<16x1xf32> to vector<16x32xf32>
    %11 = arith.mulf %9, %10 : vector<16x32xf32>
    %12 = arith.truncf %11 : vector<16x32xf32> to vector<16x32xbf16>
    %c0_4 = arith.constant 0 : index
    %c0_5 = arith.constant 0 : index
    %13 = vector.load %arg3[%c0_4, %c0_5] : memref<32x96xbf16, #tpu.memory_space<vmem>>, vector<32x96xbf16>
    %cst_6 = arith.constant dense<0.000000e+00> : vector<16x96xf32>
    %14 = tpu.matmul %12, %13, %cst_6 {dimension_numbers = #tpu.dot_dimension_numbers<[1], [0], [0], [1], [0, 0, 1, 1], [], []>} : vector<16x32xbf16>, vector<32x96xbf16>, vector<16x96xf32> -> vector<16x96xf32>
    %c0_7 = arith.constant 0 : index
    %c0_8 = arith.constant 0 : index
    %15 = vector.load %arg4[%c0_7, %c0_8] : memref<1x96xf32, #tpu.memory_space<vmem>>, vector<1x96xf32>
    %16 = vector.broadcast %15 : vector<1x96xf32> to vector<16x96xf32>
    %17 = arith.addf %14, %16 : vector<16x96xf32>
    %18 = vector.extract_strided_slice %17 {offsets = [0, 0], sizes = [16, 32], strides = [1, 1]} : vector<16x96xf32> to vector<16x32xf32>
    %cst_9 = arith.constant 5.000000e-01 : f32
    %19 = vector.broadcast %cst_9 : f32 to vector<16x32xf32>
    %20 = arith.mulf %18, %19 : vector<16x32xf32>
    %21 = vector.extract_strided_slice %17 {offsets = [0, 32], sizes = [16, 64], strides = [1, 1]} : vector<16x96xf32> to vector<16x64xf32>
    %c0_10 = arith.constant 0 : index
    %c0_11 = arith.constant 0 : index
    %22 = vector.load %arg13[%c0_10, %c0_11] : memref<128x32xf32, #tpu.memory_space<vmem>>, vector<128x32xf32>
    %c0_12 = arith.constant 0 : index
    %c0_13 = arith.constant 0 : index
    %23 = vector.load %arg12[%c0_12, %c0_13] : memref<128x16xf32, #tpu.memory_space<vmem>>, vector<128x16xf32>
    %cst_14 = arith.constant dense<0.000000e+00> : vector<128x64xf32>
    %24 = tpu.matmul %23, %21, %cst_14 {dimension_numbers = #tpu.dot_dimension_numbers<[1], [0], [0], [1], [0, 0, 1, 1], [], []>} : vector<128x16xf32>, vector<16x64xf32>, vector<128x64xf32> -> vector<128x64xf32>
    %25 = vector.extract_strided_slice %24 {offsets = [0, 0], sizes = [128, 32], strides = [1, 1]} : vector<128x64xf32> to vector<128x32xf32>
    %26 = arith.mulf %25, %22 : vector<128x32xf32>
    %27 = vector.extract_strided_slice %24 {offsets = [0, 32], sizes = [128, 32], strides = [1, 1]} : vector<128x64xf32> to vector<128x32xf32>
    %28 = arith.mulf %27, %22 : vector<128x32xf32>
    %cst_15 = arith.constant dense<0.000000e+00> : vector<16x128xf32>
    %29 = tpu.matmul %20, %26, %cst_15 {dimension_numbers = #tpu.dot_dimension_numbers<[1], [1], [0], [0], [0, 0, 1, 0], [], []>} : vector<16x32xf32>, vector<128x32xf32>, vector<16x128xf32> -> vector<16x128xf32>
    %c0_16 = arith.constant 0 : index
    %c0_17 = arith.constant 0 : index
    %30 = vector.load %arg14[%c0_16, %c0_17] : memref<16x128xf32, #tpu.memory_space<vmem>>, vector<16x128xf32>
    %cst_18 = arith.constant 1.000000e+30 : f32
    %31 = vector.broadcast %cst_18 : f32 to vector<16x128xf32>
    %32 = arith.mulf %30, %31 : vector<16x128xf32>
    %33 = arith.subf %29, %32 : vector<16x128xf32>
    %cst_19 = arith.constant dense<0xFF800000> : vector<16xf32>
    %34 = vector.multi_reduction <maximumf>, %33, %cst_19 [1] : vector<16x128xf32> to vector<16xf32>
    %35 = vector.shape_cast %34 : vector<16xf32> to vector<16x1xf32>
    %36 = vector.broadcast %35 : vector<16x1xf32> to vector<16x128xf32>
    %37 = arith.subf %33, %36 : vector<16x128xf32>
    %38 = math.exp %37 : vector<16x128xf32>
    %c0_20 = arith.constant 0 : index
    %c0_21 = arith.constant 0 : index
    %39 = vector.load %arg15[%c0_20, %c0_21] : memref<128x128xf32, #tpu.memory_space<vmem>>, vector<128x128xf32>
    %cst_22 = arith.constant dense<0.000000e+00> : vector<16x128xf32>
    %40 = tpu.matmul %38, %39, %cst_22 {dimension_numbers = #tpu.dot_dimension_numbers<[1], [0], [0], [1], [0, 0, 1, 1], [], []>} : vector<16x128xf32>, vector<128x128xf32>, vector<16x128xf32> -> vector<16x128xf32>
    %41 = arith.addf %40, %30 : vector<16x128xf32>
    %42 = tpu.reciprocal %41 {approx = true} : vector<16x128xf32> -> vector<16x128xf32>
    %43 = arith.mulf %41, %42 : vector<16x128xf32>
    %cst_23 = arith.constant 2.000000e+00 : f32
    %44 = vector.broadcast %cst_23 : f32 to vector<16x128xf32>
    %45 = arith.subf %44, %43 : vector<16x128xf32>
    %46 = arith.mulf %42, %45 : vector<16x128xf32>
    %47 = arith.mulf %38, %46 : vector<16x128xf32>
    %48 = arith.truncf %47 : vector<16x128xf32> to vector<16x128xbf16>
    %49 = arith.truncf %28 : vector<128x32xf32> to vector<128x32xbf16>
    %cst_24 = arith.constant dense<0.000000e+00> : vector<16x32xf32>
    %50 = tpu.matmul %48, %49, %cst_24 {dimension_numbers = #tpu.dot_dimension_numbers<[1], [0], [0], [1], [0, 0, 1, 1], [], []>} : vector<16x128xbf16>, vector<128x32xbf16>, vector<16x32xf32> -> vector<16x32xf32>
    %51 = arith.truncf %50 : vector<16x32xf32> to vector<16x32xbf16>
    %c0_25 = arith.constant 0 : index
    %c0_26 = arith.constant 0 : index
    %52 = vector.load %arg5[%c0_25, %c0_26] : memref<32x32xbf16, #tpu.memory_space<vmem>>, vector<32x32xbf16>
    %cst_27 = arith.constant dense<0.000000e+00> : vector<16x32xf32>
    %53 = tpu.matmul %51, %52, %cst_27 {dimension_numbers = #tpu.dot_dimension_numbers<[1], [0], [0], [1], [0, 0, 1, 1], [], []>} : vector<16x32xbf16>, vector<32x32xbf16>, vector<16x32xf32> -> vector<16x32xf32>
    %c0_28 = arith.constant 0 : index
    %c0_29 = arith.constant 0 : index
    %54 = vector.load %arg6[%c0_28, %c0_29] : memref<1x32xf32, #tpu.memory_space<vmem>>, vector<1x32xf32>
    %55 = vector.broadcast %54 : vector<1x32xf32> to vector<16x32xf32>
    %56 = arith.addf %53, %55 : vector<16x32xf32>
    %57 = arith.addf %0, %56 : vector<16x32xf32>
    %58 = arith.mulf %57, %57 : vector<16x32xf32>
    %cst_30 = arith.constant dense<0.000000e+00> : vector<16xf32>
    %59 = vector.multi_reduction <add>, %58, %cst_30 [1] : vector<16x32xf32> to vector<16xf32>
    %60 = vector.shape_cast %59 : vector<16xf32> to vector<16x1xf32>
    %cst_31 = arith.constant 9.99999997E-7 : f32
    %61 = vector.broadcast %cst_31 : f32 to vector<16x1xf32>
    %62 = arith.addf %60, %61 : vector<16x1xf32>
    %63 = math.rsqrt %62 : vector<16x1xf32>
    %c0_32 = arith.constant 0 : index
    %c0_33 = arith.constant 0 : index
    %64 = vector.load %arg7[%c0_32, %c0_33] : memref<1x32xf32, #tpu.memory_space<vmem>>, vector<1x32xf32>
    %65 = vector.broadcast %64 : vector<1x32xf32> to vector<16x32xf32>
    %66 = arith.mulf %65, %57 : vector<16x32xf32>
    %67 = vector.broadcast %63 : vector<16x1xf32> to vector<16x32xf32>
    %68 = arith.mulf %66, %67 : vector<16x32xf32>
    %69 = arith.truncf %68 : vector<16x32xf32> to vector<16x32xbf16>
    %c0_34 = arith.constant 0 : index
    %c0_35 = arith.constant 0 : index
    %70 = vector.load %arg8[%c0_34, %c0_35] : memref<32x128xbf16, #tpu.memory_space<vmem>>, vector<32x128xbf16>
    %cst_36 = arith.constant dense<0.000000e+00> : vector<16x128xf32>
    %71 = tpu.matmul %69, %70, %cst_36 {dimension_numbers = #tpu.dot_dimension_numbers<[1], [0], [0], [1], [0, 0, 1, 1], [], []>} : vector<16x32xbf16>, vector<32x128xbf16>, vector<16x128xf32> -> vector<16x128xf32>
    %c0_37 = arith.constant 0 : index
    %c0_38 = arith.constant 0 : index
    %72 = vector.load %arg9[%c0_37, %c0_38] : memref<1x128xf32, #tpu.memory_space<vmem>>, vector<1x128xf32>
    %73 = vector.broadcast %72 : vector<1x128xf32> to vector<16x128xf32>
    %74 = arith.addf %71, %73 : vector<16x128xf32>
    %cst_39 = arith.constant 5.000000e-01 : f32
    %75 = vector.broadcast %cst_39 : f32 to vector<16x128xf32>
    %76 = arith.mulf %75, %74 : vector<16x128xf32>
    %cst_40 = arith.constant 0.707106769 : f32
    %77 = vector.broadcast %cst_40 : f32 to vector<16x128xf32>
    %78 = arith.mulf %74, %77 : vector<16x128xf32>
    %79 = math.erf %78 : vector<16x128xf32>
    %cst_41 = arith.constant 1.000000e+00 : f32
    %80 = vector.broadcast %cst_41 : f32 to vector<16x128xf32>
    %81 = arith.addf %80, %79 : vector<16x128xf32>
    %82 = arith.mulf %76, %81 : vector<16x128xf32>
    %83 = arith.truncf %82 : vector<16x128xf32> to vector<16x128xbf16>
    %c0_42 = arith.constant 0 : index
    %c0_43 = arith.constant 0 : index
    %84 = vector.load %arg10[%c0_42, %c0_43] : memref<128x32xbf16, #tpu.memory_space<vmem>>, vector<128x32xbf16>
    %cst_44 = arith.constant dense<0.000000e+00> : vector<16x32xf32>
    %85 = tpu.matmul %83, %84, %cst_44 {dimension_numbers = #tpu.dot_dimension_numbers<[1], [0], [0], [1], [0, 0, 1, 1], [], []>} : vector<16x128xbf16>, vector<128x32xbf16>, vector<16x32xf32> -> vector<16x32xf32>
    %c0_45 = arith.constant 0 : index
    %c0_46 = arith.constant 0 : index
    %86 = vector.load %arg11[%c0_45, %c0_46] : memref<1x32xf32, #tpu.memory_space<vmem>>, vector<1x32xf32>
    %87 = vector.broadcast %86 : vector<1x32xf32> to vector<16x32xf32>
    %88 = arith.addf %85, %87 : vector<16x32xf32>
    %89 = arith.addf %57, %88 : vector<16x32xf32>
    %c0_47 = arith.constant 0 : index
    %c0_48 = arith.constant 0 : index
    %90 = vector.load %arg16[%c0_47, %c0_48] : memref<16x32xf32, #tpu.memory_space<vmem>>, vector<16x32xf32>
    tpu.vector_store %arg16[%c0_47, %c0_48], %89 {strides = array<i32>} : memref<16x32xf32, #tpu.memory_space<vmem>>, vector<16x32xf32>,
    return
  }
  func.func @transform_0(%arg0: i32) -> (i32, i32) {
    %c0_i32 = arith.constant 0 : i32
    %c0_i32_0 = arith.constant 0 : i32
    return %arg0, %c0_i32 : i32, i32
  }
  func.func @transform_1(%arg0: i32) -> (i32, i32) {
    %c0_i32 = arith.constant 0 : i32
    %c0_i32_0 = arith.constant 0 : i32
    %c0_i32_1 = arith.constant 0 : i32
    return %c0_i32, %c0_i32_0 : i32, i32
  }
  func.func @transform_2(%arg0: i32) -> (i32, i32) {
    %c0_i32 = arith.constant 0 : i32
    %c0_i32_0 = arith.constant 0 : i32
    %c0_i32_1 = arith.constant 0 : i32
    return %c0_i32, %c0_i32_0 : i32, i32
  }
  func.func @transform_3(%arg0: i32) -> (i32, i32) {
    %c0_i32 = arith.constant 0 : i32
    %c0_i32_0 = arith.constant 0 : i32
    %c0_i32_1 = arith.constant 0 : i32
    return %c0_i32, %c0_i32_0 : i32, i32
  }
  func.func @transform_4(%arg0: i32) -> (i32, i32) {
    %c0_i32 = arith.constant 0 : i32
    %c0_i32_0 = arith.constant 0 : i32
    %c0_i32_1 = arith.constant 0 : i32
    return %c0_i32, %c0_i32_0 : i32, i32
  }
  func.func @transform_5(%arg0: i32) -> (i32, i32) {
    %c0_i32 = arith.constant 0 : i32
    %c0_i32_0 = arith.constant 0 : i32
    %c0_i32_1 = arith.constant 0 : i32
    return %c0_i32, %c0_i32_0 : i32, i32
  }
  func.func @transform_6(%arg0: i32) -> (i32, i32) {
    %c0_i32 = arith.constant 0 : i32
    %c0_i32_0 = arith.constant 0 : i32
    %c0_i32_1 = arith.constant 0 : i32
    return %c0_i32, %c0_i32_0 : i32, i32
  }
  func.func @transform_7(%arg0: i32) -> (i32, i32) {
    %c0_i32 = arith.constant 0 : i32
    %c0_i32_0 = arith.constant 0 : i32
    %c0_i32_1 = arith.constant 0 : i32
    return %c0_i32, %c0_i32_0 : i32, i32
  }
  func.func @transform_8(%arg0: i32) -> (i32, i32) {
    %c0_i32 = arith.constant 0 : i32
    %c0_i32_0 = arith.constant 0 : i32
    %c0_i32_1 = arith.constant 0 : i32
    return %c0_i32, %c0_i32_0 : i32, i32
  }
  func.func @transform_9(%arg0: i32) -> (i32, i32) {
    %c0_i32 = arith.constant 0 : i32
    %c0_i32_0 = arith.constant 0 : i32
    %c0_i32_1 = arith.constant 0 : i32
    return %c0_i32, %c0_i32_0 : i32, i32
  }
  func.func @transform_10(%arg0: i32) -> (i32, i32) {
    %c0_i32 = arith.constant 0 : i32
    %c0_i32_0 = arith.constant 0 : i32
    %c0_i32_1 = arith.constant 0 : i32
    return %c0_i32, %c0_i32_0 : i32, i32
  }
  func.func @transform_11(%arg0: i32) -> (i32, i32) {
    %c0_i32 = arith.constant 0 : i32
    %c0_i32_0 = arith.constant 0 : i32
    %c0_i32_1 = arith.constant 0 : i32
    return %c0_i32, %c0_i32_0 : i32, i32
  }
  func.func @transform_12(%arg0: i32) -> (i32, i32) {
    %c0_i32 = arith.constant 0 : i32
    %c0_i32_0 = arith.constant 0 : i32
    %c0_i32_1 = arith.constant 0 : i32
    return %c0_i32, %c0_i32_0 : i32, i32
  }
  func.func @transform_13(%arg0: i32) -> (i32, i32) {
    %c0_i32 = arith.constant 0 : i32
    %c0_i32_0 = arith.constant 0 : i32
    %c0_i32_1 = arith.constant 0 : i32
    return %c0_i32, %c0_i32_0 : i32, i32
  }
  func.func @transform_14(%arg0: i32) -> (i32, i32) {
    %c0_i32 = arith.constant 0 : i32
    %c0_i32_0 = arith.constant 0 : i32
    %c0_i32_1 = arith.constant 0 : i32
    return %c0_i32, %c0_i32_0 : i32, i32
  }
  func.func @transform_15(%arg0: i32) -> (i32, i32) {
    %c0_i32 = arith.constant 0 : i32
    %c0_i32_0 = arith.constant 0 : i32
    return %arg0, %c0_i32 : i32, i32
  }
}

</mosaic_0001>

<bundles_post_ra>
// kernel: tpu_custom_call.1
= control target key start
LH: loop header
LB: loop body
LE: loop exit
PB: predicated region body
PF: predicated region fallthrough
CT: control target
= control target key end

     0   :  { %vm56_vm0 = vcmask 261120   ;;  %s2070_s0 = inlined_call_operand.vmem [shape: f32[16,32], index: 0, kind: input, shape index: {}]   ;;  %s2071_s1 = inlined_call_operand.vmem [shape: f32[1,32], index: 1, kind: input, shape index: {}]   ;;  %s2072_s2 = inlined_call_operand.vmem [shape: bf16[32,96], index: 2, kind: input, shape index: {}]   ;;  %s2073_s3 = inlined_call_operand.vmem [shape: f32[1,96], index: 3, kind: input, shape index: {}]   ;;  %s2074_s4 = inlined_call_operand.vmem [shape: bf16[32,32], index: 4, kind: input, shape index: {}]   ;;  %s2075_s5 = inlined_call_operand.vmem [shape: f32[1,32], index: 5, kind: input, shape index: {}]   ;;  %s2076_s6 = inlined_call_operand.vmem [shape: f32[1,32], index: 6, kind: input, shape index: {}]   ;;  %s2077_s7 = inlined_call_operand.vmem [shape: bf16[32,128], index: 7, kind: input, shape index: {}]   ;;  %s2078_s8 = inlined_call_operand.vmem [shape: f32[1,128], index: 8, kind: input, shape index: {}]   ;;  %s2079_s9 = inlined_call_operand.vmem [shape: bf16[128,32], index: 9, kind: input, shape index: {}]   ;;  %s2080_s10 = inlined_call_operand.vmem [shape: f32[1,32], index: 10, kind: input, shape index: {}]   ;;  %s2081_s11 = inlined_call_operand.vmem [shape: f32[128,16], index: 11, kind: input, shape index: {}]   ;;  %s2082_s12 = inlined_call_operand.vmem [shape: f32[128,32], index: 12, kind: input, shape index: {}]   ;;  %s2083_s13 = inlined_call_operand.vmem [shape: f32[16,128], index: 13, kind: input, shape index: {}]   ;;  %s2084_s14 = inlined_call_operand.vmem [shape: f32[128,128], index: 14, kind: input, shape index: {}]   ;;  %s2085_s15 = inlined_call_operand.hbm [shape: f32[16,32], index: 15, kind: output, shape index: {}]  }
   0x1   :  { %v1563_v0 = vld [vmem:[%s2070_s0] sm:$0xff]  ;;  %v1568_v1 = vld [vmem:[%s2070_s0 + $0x8] sm:$0xff] }
   0x2   :  { %v54_v2 = vmul.f32 %v1563_v0, %v1563_v0  ;;  %v55_v3 = vmul.f32 %v1568_v1, %v1568_v1 }
   0x4   :  { %v57_v4 = vsel %vm56_vm0, %v54_v2, 0.0  ;;  %v60_v5 = vsel %vm56_vm0, %v55_v3, 0.0 }
   0x5   :  { %58 = vadd.xlane.f32.xlu0 %v57_v4 }
   0x9   :  { %61 = vadd.xlane.f32.xlu0 %v60_v5 }
   0xa   :  { %20 = vsyncpa [#allocation3], 0  ;;  %v1417_v6 = vld [vmem:[%s2072_s2 + $0x8] sm:$0xff]   ;;  %v1473_v7 = vmov 0.0   ;;  %vm1474_vm1 = vmmov 0   ;;  %v1418_v8 = vld [vmem:[%s2072_s2] sm:$0xff]  }
   0xb   :  { %1248 = vmatprep.subr.bf16.mxu0 %v1473_v7  ;;  %1252 = vmatprep.mubr.msk.bf16.mxu0 %vm1474_vm1, %v1473_v7  ;;  %v1110_v13 = vld [vmem:[%s2071_s1] ss:$0 sm:$0xff]  ;;  %vm188_vm2 = vcmask 130048   ;;  %s1475_s29 = smov 96   ;;  %v1607_v29 = vld [vmem:[%s2082_s12 + $0x70] sm:$0xff]  ;;  %s1476_s17 = smov 32  }
   0xc   :  { %1249 = vmatpush3.bf16.msra.mxu0 %v1417_v6  ;;  %v74_v14 = vmul.f32 %v1110_v13, %v1563_v0  ;;  %v75_v15 = vmul.f32 %v1110_v13, %v1568_v1  ;;  %v164_v21 = vld [vmem:[%s2081_s11] sm:$0xff]  ;;  %v1621_v31 = vld [vmem:[%s2082_s12 + $0x68] sm:$0xff]  ;;  %v1628_v32 = vld [vmem:[%s2082_s12 + $0x50] sm:$0xff] }
   0xd   :  { %1250 = vmatprep.subr.bf16.mxu0 %v1473_v7  ;;  %v1111_v24 = vld [vmem:[%s2073_s3] ss:$0 sm:$0xff]  ;;  %v1635_v33 = vld [vmem:[%s2082_s12 + $0x58] sm:$0xff]  ;;  %v1649_v35 = vld [vmem:[%s2082_s12 + $0x48] sm:$0xff] }
   0xe   :  { %v1614_v30 = vld [vmem:[%s2082_s12 + $0x60] sm:$0xff]  ;;  %v1656_v36 = vld [vmem:[%s2082_s12 + $0x38] sm:$0xff]  ;;  %v1663_v37 = vld [vmem:[%s2082_s12 + $0x28] sm:$0xff] }
   0xf   :  { %v1642_v34 = vld [vmem:[%s2082_s12 + $0x40] sm:$0xff]  ;;  %v1670_v38 = vld [vmem:[%s2082_s12 + $0x18] sm:$0xff]  ;;  %v1677_v39 = vld [vmem:[%s2082_s12 + $0x8] sm:$0xff] }
  0x10   :  { %1251 = vmatpush3.bf16.msra.mxu0 %v1418_v8  ;;  %v165_v42 = vld [vmem:[%s2081_s11 + $0x8] sm:$0xff]  ;;  %v166_v43 = vld [vmem:[%s2081_s11 + $0x10] sm:$0xff]  ;;  %v167_v44 = vld [vmem:[%s2081_s11 + $0x18] sm:$0xff] }
  0x11   :  { %v168_v45 = vld [vmem:[%s2081_s11 + $0x20] sm:$0xff]  ;;  %v169_v46 = vld [vmem:[%s2081_s11 + $0x28] sm:$0xff]  ;;  %v170_v47 = vld [vmem:[%s2081_s11 + $0x30] sm:$0xff] }
  0x12   :  { %v171_v48 = vld [vmem:[%s2081_s11 + $0x38] sm:$0xff]  ;;  %v172_v49 = vld [vmem:[%s2081_s11 + $0x40] sm:$0xff]  ;;  %v173_v50 = vld [vmem:[%s2081_s11 + $0x48] sm:$0xff] }
  0x13   :  { %v174_v51 = vld [vmem:[%s2081_s11 + $0x50] sm:$0xff]  ;;  %v175_v52 = vld [vmem:[%s2081_s11 + $0x58] sm:$0xff]  ;;  %v176_v53 = vld [vmem:[%s2081_s11 + $0x60] sm:$0xff] }
  0x14   :  { %v177_v54 = vld [vmem:[%s2081_s11 + $0x68] sm:$0xff]  ;;  %v178_v55 = vld [vmem:[%s2081_s11 + $0x70] sm:$0xff]  ;;  %v179_v56 = vld [vmem:[%s2081_s11 + $0x78] sm:$0xff] }
  0x8e   :  { %v59_v9 = vpop.xlane.xlu0 %58 }
  0x8f   :  { %v63_v10 = vadd.f32 1e-06, %v59_v9 }
  0x91   :  { %1431 = vrsqrt.f32 %v63_v10 }
  0x92   :  { %v62_v11 = vpop.xlane.xlu0 %61 }
  0x93   :  { %v64_v12 = vadd.f32 1e-06, %v62_v11 }
  0x95   :  { %1433 = vrsqrt.f32 %v64_v12 }
  0x9e   :  { %v1432_v16 = vpop.eup %1431 }
  0x9f   :  { %v76_v18 = vmul.f32 %v1432_v16, %v74_v14 }
  0xa2   :  { %v1434_v17 = vpop.eup %1433 }
  0xa3   :  { %v77_v19 = vmul.f32 %v1434_v17, %v75_v15 }
  0xa5   :  { %v78_v20 = vpack.c.bf16 %v77_v19, %v76_v18 }
  0xa7   :  { %1253 = vmatmul.mubr.msk.bf16.vlgmr.msra.gmra.mxu0 %vm56_vm0, %v78_v20 }
  0xa8   :  { %1260 = vmatprep.mubr.msk.f32.mxu0 %vm188_vm2, %v164_v21 }
 0x167   :  { %v139_v22 = vpop.f32.mrf.mxu0 }
 0x168   :  { %v140_v28 = vadd.f32 %v1111_v24, %v139_v22 }
 0x169   :  { %v1254_v23 = vpop.f32.mrf.mxu0 }
 0x16a   :  { %v146_v57 = vmul.f32 0.5, %v140_v28 }
 0x16b   :  { %v142_v25 = vpop.f32.mrf.mxu0 }
 0x16c   :  { %v1599_v26 = vadd.f32 %v1111_v24, %v142_v25  ;;  %v1775_v24 = vld [vmem:[%s2082_s12 + $0x78] sm:$0xff] }
 0x16d   :  { %v1255_v27 = vpop.f32.mrf.mxu0 }
 0x16e   :  { %184 = vrot.lane.b32.xlu1 %v1599_v26, %s1475_s29 }
 0x172   :  { %182 = vrot.lane.b32.xlu1 %v140_v28, %s1475_s29 }
 0x176   :  { %442 = vrot.lane.b32.xlu1 %v1607_v29, %s1476_s17 }
 0x17a   :  { %438 = vrot.lane.b32.xlu1 %v1614_v30, %s1476_s17 }
 0x17e   :  { %440 = vrot.lane.b32.xlu1 %v1621_v31, %s1476_s17 }
 0x182   :  { %434 = vrot.lane.b32.xlu1 %v1628_v32, %s1476_s17 }
 0x186   :  { %436 = vrot.lane.b32.xlu1 %v1635_v33, %s1476_s17 }
 0x18a   :  { %430 = vrot.lane.b32.xlu1 %v1642_v34, %s1476_s17 }
 0x18e   :  { %432 = vrot.lane.b32.xlu1 %v1649_v35, %s1476_s17 }
 0x192   :  { %428 = vrot.lane.b32.xlu1 %v1656_v36, %s1476_s17 }
 0x196   :  { %424 = vrot.lane.b32.xlu1 %v1663_v37, %s1476_s17 }
 0x19a   :  { %420 = vrot.lane.b32.xlu1 %v1670_v38, %s1476_s17 }
 0x19e   :  { %416 = vrot.lane.b32.xlu1 %v1677_v39, %s1476_s17 }
 0x1e0   :  { %v185_v40 = vpop.permute.xlu1 %184 }
 0x1e1   :  { %1256 = vmatprep.subr.mxu0 %v185_v40 }
 0x1e2   :  { %1257 = vmatpush3.msra.mxu0 %v185_v40 }
 0x1e4   :  { %v183_v41 = vpop.permute.xlu1 %182 }
 0x1e5   :  { %1258 = vmatprep.subr.mxu0 %v183_v41 }
 0x1e6   :  { %1259 = vmatpush3.msra.mxu0 %v183_v41 }
 0x1e7   :  { %1261 = vmatmul.mubr.msk.f32.vlgmr.msra.gmra.mxu0 %vm188_vm2, %v165_v42 }
 0x1e8   :  { %1263 = vmatprep.mubr.msk.f32.mxu0 %vm188_vm2, %v166_v43  ;;  %v1742_v58 = vpop.permute.xlu1 %442 }
 0x1eb   :  { %1264 = vmatmul.mubr.msk.f32.gmra.mxu0 %vm188_vm2, %v167_v44 }
 0x1ec   :  { %1266 = vmatprep.mubr.msk.f32.mxu0 %vm188_vm2, %v168_v45  ;;  %v439_v59 = vpop.permute.xlu1 %438 }
 0x1ef   :  { %1267 = vmatmul.mubr.msk.f32.gmra.mxu0 %vm188_vm2, %v169_v46 }
 0x1f0   :  { %1269 = vmatprep.mubr.msk.f32.mxu0 %vm188_vm2, %v170_v47  ;;  %v441_v60 = vpop.permute.xlu1 %440 }
 0x1f3   :  { %1270 = vmatmul.mubr.msk.f32.gmra.mxu0 %vm188_vm2, %v171_v48 }
 0x1f4   :  { %1272 = vmatprep.mubr.msk.f32.mxu0 %vm188_vm2, %v172_v49  ;;  %v435_v61 = vpop.permute.xlu1 %434 }
 0x1f7   :  { %1273 = vmatmul.mubr.msk.f32.gmra.mxu0 %vm188_vm2, %v173_v50 }
 0x1f8   :  { %1275 = vmatprep.mubr.msk.f32.mxu0 %vm188_vm2, %v174_v51  ;;  %v437_v3 = vpop.permute.xlu1 %436 }
 0x1fb   :  { %1276 = vmatmul.mubr.msk.f32.gmra.mxu0 %vm188_vm2, %v175_v52  ;;  %v638_v52 = vld [vmem:[%s2084_s14 + $0x78] sm:$0xff] }
 0x1fc   :  { %1278 = vmatprep.mubr.msk.f32.mxu0 %vm188_vm2, %v176_v53  ;;  %v431_v8 = vpop.permute.xlu1 %430  ;;  %v637_v53 = vld [vmem:[%s2084_s14 + $0x70] sm:$0xff]  ;;  %1319 = vmatprep.subr.mxu0 %v638_v52 }
 0x1fd   :  { %1320 = vmatpush3.msra.mxu0 %v638_v52 }
 0x1fe   :  { %1321 = vmatprep.subr.mxu0 %v637_v53 }
 0x1ff   :  { %1279 = vmatmul.mubr.msk.f32.gmra.mxu0 %vm188_vm2, %v177_v54  ;;  %v635_v54 = vld [vmem:[%s2084_s14 + $0x60] sm:$0xff] }
 0x200   :  { %1281 = vmatprep.mubr.msk.f32.mxu0 %vm188_vm2, %v178_v55  ;;  %v433_v12 = vpop.permute.xlu1 %432  ;;  %1322 = vmatpush3.msra.mxu0 %v637_v53  ;;  %v634_v55 = vld [vmem:[%s2084_s14 + $0x58] sm:$0xff] }
 0x203   :  { %1282 = vmatmul.mubr.msk.f32.gmra.mxu0 %vm188_vm2, %v179_v56  ;;  %v633_v56 = vld [vmem:[%s2084_s14 + $0x50] sm:$0xff] }
 0x204   :  { %1316 = vmatprep.mubr.msk.f32.mxu0 %vm56_vm0, %v146_v57  ;;  %v632_v57 = vld [vmem:[%s2084_s14 + $0x48] sm:$0xff] }
 0x2a7   :  { %v1744_v62 = vpop.f32.mrf.mxu0 }
 0x2a8   :  { %v383_v50 = vmul.f32 %v1744_v62, %v1677_v39  ;;  %v147_v39 = vmul.f32 0.5, %v1599_v26  ;;  %v636_v26 = vld [vmem:[%s2084_s14 + $0x68] sm:$0xff] }
 0x2a9   :  { %v1746_v63 = vpop.f32.mrf.mxu0  ;;  %1323 = vmatprep.subr.mxu0 %v636_v26 }
 0x2aa   :  { %1324 = vmatpush3.msra.mxu0 %v636_v26 }
 0x2ab   :  { %v1748_v2 = vpop.f32.mrf.mxu0  ;;  %1325 = vmatprep.subr.mxu0 %v635_v54 }
 0x2ac   :  { %v385_v48 = vmul.f32 %v1748_v2, %v1670_v38  ;;  %v1856_v38 = vld [vmem:[%s2082_s12] sm:$0xff]  ;;  %1326 = vmatpush3.msra.mxu0 %v635_v54 }
 0x2ad   :  { %v1750_v4 = vpop.f32.mrf.mxu0  ;;  %v382_v51 = vmul.f32 %v1746_v63, %v1856_v38  ;;  %1327 = vmatprep.subr.mxu0 %v634_v55 }
 0x2ae   :  { %1328 = vmatpush3.msra.mxu0 %v634_v55 }
 0x2af   :  { %v1752_v5 = vpop.f32.mrf.mxu0  ;;  %1329 = vmatprep.subr.mxu0 %v633_v56 }
 0x2b0   :  { %1330 = vmatpush3.msra.mxu0 %v633_v56 }
 0x2b1   :  { %v1754_v6 = vpop.f32.mrf.mxu0  ;;  %1331 = vmatprep.subr.mxu0 %v632_v57 }
 0x2b2   :  { %1332 = vmatpush3.msra.mxu0 %v632_v57 }
 0x2b3   :  { %v1756_v9 = vpop.f32.mrf.mxu0 }
 0x2b5   :  { %v1758_v10 = vpop.f32.mrf.mxu0 }
 0x2b7   :  { %v1274_v11 = vpop.f32.mrf.mxu0 }
 0x2b8   :  { %v1760_v14 = vmul.f32 %v1274_v11, %v433_v12  ;;  %v629_v12 = vld [vmem:[%s2084_s14 + $0x30] sm:$0xff] }
 0x2b9   :  { %v343_v13 = vpop.f32.mrf.mxu0 }
 0x2ba   :  { %v1762_v15 = vmul.f32 %v431_v8, %v343_v13  ;;  %v631_v8 = vld [vmem:[%s2084_s14 + $0x40] sm:$0xff] }
 0x2bb   :  { %v1277_v16 = vpop.f32.mrf.mxu0  ;;  %1333 = vmatprep.subr.mxu0 %v631_v8 }
 0x2bc   :  { %v729_v17 = vpack.c.bf16 %v1760_v14, %v1762_v15  ;;  %v1766_v19 = vmul.f32 %v1277_v16, %v437_v3  ;;  %1334 = vmatpush3.msra.mxu0 %v631_v8 }
 0x2bd   :  { %v353_v18 = vpop.f32.mrf.mxu0 }
 0x2be   :  { %v1768_v20 = vmul.f32 %v435_v61, %v353_v18  ;;  %v392_v46 = vmul.f32 %v353_v18, %v1628_v32  ;;  %v1817_v32 = vld [vmem:[%s2082_s12 + $0x30] sm:$0xff]  ;;  %v626_v18 = vld [vmem:[%s2084_s14 + $0x18] sm:$0xff] }
 0x2bf   :  { %v1280_v21 = vpop.f32.mrf.mxu0 }
 0x2c0   :  { %v730_v22 = vpack.c.bf16 %v1766_v19, %v1768_v20  ;;  %v1777_v25 = vmul.f32 %v1280_v21, %v441_v60  ;;  %v395_v44 = vmul.f32 %v1280_v21, %v1621_v31  ;;  %v391_v31 = vmul.f32 %v1274_v11, %v1649_v35  ;;  %v630_v11 = vld [vmem:[%s2084_s14 + $0x38] sm:$0xff]  ;;  %v625_v21 = vld [vmem:[%s2084_s14 + $0x10] sm:$0xff] }
 0x2c1   :  { %v363_v23 = vpop.f32.mrf.mxu0  ;;  %v388_v35 = vmul.f32 %v1758_v10, %v1817_v32  ;;  %1335 = vmatprep.subr.mxu0 %v630_v11 }
 0x2c2   :  { %v1779_v27 = vmul.f32 %v439_v59, %v363_v23  ;;  %v394_v45 = vmul.f32 %v363_v23, %v1614_v30  ;;  %v390_v30 = vmul.f32 %v343_v13, %v1642_v34  ;;  %v387_v34 = vmul.f32 %v1752_v5, %v1663_v37  ;;  %v1843_v37 = vld [vmem:[%s2082_s12 + $0x10] sm:$0xff]  ;;  %v1894_v59 = vld [vmem:[%s2083_s13 + $0x8] sm:$0xff]  ;;  %1336 = vmatpush3.msra.mxu0 %v630_v11 }
 0x2c3   :  { %v1781_v28 = vpop.f32.mrf.mxu0  ;;  %v384_v49 = vmul.f32 %v1750_v4, %v1843_v37  ;;  %v610_v60 = vmul.f32 1e+30, %v1894_v59  ;;  %1337 = vmatprep.subr.mxu0 %v629_v12  ;;  %v628_v13 = vld [vmem:[%s2084_s14 + $0x28] sm:$0xff] }
 0x2c4   :  { %v731_v40 = vpack.c.bf16 %v1777_v25, %v1779_v27  ;;  %v397_v41 = vmul.f32 %v1781_v28, %v1775_v24  ;;  %1338 = vmatpush3.msra.mxu0 %v629_v12  ;;  %v624_v23 = vld [vmem:[%s2084_s14 + $0x8] sm:$0xff] }
 0x2c5   :  { %v1787_v42 = vpop.f32.mrf.mxu0  ;;  %1339 = vmatprep.subr.mxu0 %v628_v13 }
 0x2c6   :  { %v396_v43 = vmul.f32 %v1787_v42, %v1607_v29  ;;  %1284 = vmatprep.subr.msk.mxu1 %vm56_vm0, %v397_v41  ;;  %v393_v29 = vmul.f32 %v1277_v16, %v1635_v33  ;;  %v389_v33 = vmul.f32 %v1756_v9, %v1656_v36  ;;  %v1830_v36 = vld [vmem:[%s2082_s12 + $0x20] sm:$0xff]  ;;  %1340 = vmatpush3.msra.mxu0 %v628_v13 }
 0x2c7   :  { %1285 = vmatpush3.xpose.msk.msra.mxu1 %vm56_vm0, %v397_v41  ;;  %v386_v47 = vmul.f32 %v1754_v6, %v1830_v36  ;;  %v627_v16 = vld [vmem:[%s2084_s14 + $0x20] sm:$0xff] }
 0x2c8   :  { %1286 = vmatprep.subr.msk.mxu1 %vm56_vm0, %v396_v43  ;;  %1341 = vmatprep.subr.mxu0 %v627_v16  ;;  %v623_v41 = vld [vmem:[%s2084_s14] sm:$0xff] }
 0x2c9   :  { %1342 = vmatpush3.msra.mxu0 %v627_v16 }
 0x2ca   :  { %1343 = vmatprep.subr.mxu0 %v626_v18 }
 0x2cb   :  { %1287 = vmatpush3.xpose.msk.msra.mxu1 %vm56_vm0, %v396_v43  ;;  %1344 = vmatpush3.msra.mxu0 %v626_v18 }
 0x2cc   :  { %1288 = vmatprep.subr.msk.mxu1 %vm56_vm0, %v395_v44  ;;  %1345 = vmatprep.subr.mxu0 %v625_v21 }
 0x2cd   :  { %1346 = vmatpush3.msra.mxu0 %v625_v21 }
 0x2ce   :  { %1347 = vmatprep.subr.mxu0 %v624_v23 }
 0x2cf   :  { %1289 = vmatpush3.xpose.msk.msra.mxu1 %vm56_vm0, %v395_v44  ;;  %1348 = vmatpush3.msra.mxu0 %v624_v23 }
 0x2d0   :  { %1290 = vmatprep.subr.msk.mxu1 %vm56_vm0, %v394_v45  ;;  %1349 = vmatprep.subr.mxu0 %v623_v41 }
 0x2d1   :  { %1350 = vmatpush3.msra.mxu0 %v623_v41  ;;  %v1420_v41 = vld [vmem:[%s2074_s4] sm:$0xff]  }
 0x2d2   :  { %1354 = vmatprep.subr.bf16.mxu0 %v1473_v7 }
 0x2d3   :  { %1291 = vmatpush3.xpose.msk.msra.mxu1 %vm56_vm0, %v394_v45 }
 0x2d4   :  { %1292 = vmatprep.subr.msk.mxu1 %vm56_vm0, %v393_v29 }
 0x2d7   :  { %1293 = vmatpush3.xpose.msk.msra.mxu1 %vm56_vm0, %v393_v29 }
 0x2d8   :  { %1294 = vmatprep.subr.msk.mxu1 %vm56_vm0, %v392_v46 }
 0x2db   :  { %1295 = vmatpush3.xpose.msk.msra.mxu1 %vm56_vm0, %v392_v46 }
 0x2dc   :  { %1296 = vmatprep.subr.msk.mxu1 %vm56_vm0, %v391_v31 }
 0x2df   :  { %1297 = vmatpush3.xpose.msk.msra.mxu1 %vm56_vm0, %v391_v31 }
 0x2e0   :  { %1298 = vmatprep.subr.msk.mxu1 %vm56_vm0, %v390_v30 }
 0x2e3   :  { %1299 = vmatpush3.xpose.msk.msra.mxu1 %vm56_vm0, %v390_v30 }
 0x2e4   :  { %1300 = vmatprep.subr.msk.mxu1 %vm56_vm0, %v389_v33 }
 0x2e7   :  { %1301 = vmatpush3.xpose.msk.msra.mxu1 %vm56_vm0, %v389_v33  ;;  %v476_v33 = vmul.f32 %v1742_v58, %v1787_v42 }
 0x2e8   :  { %1302 = vmatprep.subr.msk.mxu1 %vm56_vm0, %v388_v35 }
 0x2eb   :  { %1303 = vmatpush3.xpose.msk.msra.mxu1 %vm56_vm0, %v388_v35 }
 0x2ec   :  { %1304 = vmatprep.subr.msk.mxu1 %vm56_vm0, %v387_v34 }
 0x2ef   :  { %1305 = vmatpush3.xpose.msk.msra.mxu1 %vm56_vm0, %v387_v34 }
 0x2f0   :  { %1306 = vmatprep.subr.msk.mxu1 %vm56_vm0, %v386_v47 }
 0x2f3   :  { %1307 = vmatpush3.xpose.msk.msra.mxu1 %vm56_vm0, %v386_v47 }
 0x2f4   :  { %1308 = vmatprep.subr.msk.mxu1 %vm56_vm0, %v385_v48 }
 0x2f7   :  { %1309 = vmatpush3.xpose.msk.msra.mxu1 %vm56_vm0, %v385_v48 }
 0x2f8   :  { %1310 = vmatprep.subr.msk.mxu1 %vm56_vm0, %v384_v49 }
 0x2fb   :  { %1311 = vmatpush3.xpose.msk.msra.mxu1 %vm56_vm0, %v384_v49 }
 0x2fc   :  { %1312 = vmatprep.subr.msk.mxu1 %vm56_vm0, %v383_v50 }
 0x2ff   :  { %1313 = vmatpush3.xpose.msk.msra.mxu1 %vm56_vm0, %v383_v50 }
 0x300   :  { %1314 = vmatprep.subr.msk.mxu1 %vm56_vm0, %v382_v51 }
 0x303   :  { %1315 = vmatpush3.xpose.msk.msra.mxu1 %vm56_vm0, %v382_v51 }
 0x304   :  { %1390 = vmatprep.subr.bf16.mxu1 %v1473_v7 }
 0x306   :  { %1317 = vmatmul.mubr.msk.f32.vlgmr.msra.gmra.mxu1 %vm56_vm0, %v147_v39 }
 0x307   :  { %1406 = vmatprep.mubr.msk.bf16.mxu1 %vm1474_vm1, %v1473_v7 }
 0x3c6   :  { %v1318_v61 = vpop.f32.mrf.mxu1 }
 0x3c7   :  { %v612_v3 = vsub.f32 %v1318_v61, %v610_v60 }
 0x3c8   :  { %v598_v44 = vpop.f32.mrf.mxu1 }
 0x3c9   :  { %615 = vmax.xlane.f32.xlu0 %v612_v3 }
 0x3df   :  { %444 = vrot.lane.b32.xlu0 %v1775_v24, %s1476_s17  ;;  %v1938_v24 = vld [vmem:[%s2083_s13] sm:$0xff] }
 0x3e0   :  { %v609_v43 = vmul.f32 1e+30, %v1938_v24 }
 0x3e2   :  { %v611_v45 = vsub.f32 %v598_v44, %v609_v43 }
 0x3e3   :  { %426 = vrot.lane.b32.xlu0 %v1817_v32, %s1476_s17 }
 0x3e7   :  { %422 = vrot.lane.b32.xlu0 %v1830_v36, %s1476_s17  ;;  %v429_v36 = vpop.permute.xlu1 %428 }
 0x3e8   :  { %v469_v48 = vmul.f32 %v1756_v9, %v429_v36 }
 0x3eb   :  { %418 = vrot.lane.b32.xlu0 %v1843_v37, %s1476_s17  ;;  %v425_v42 = vpop.permute.xlu1 %424 }
 0x3ec   :  { %v467_v20 = vmul.f32 %v1752_v5, %v425_v42 }
 0x3ef   :  { %414 = vrot.lane.b32.xlu0 %v1856_v38, %s1476_s17  ;;  %v421_v19 = vpop.permute.xlu1 %420  ;;  %s1477_s17 = smov [#allocation2]  }
 0x3f0   :  { %v465_v9 = vmul.f32 %v1748_v2, %v421_v19  ;;  %s1099_s23 = sshll.u32 %s1477_s17, 4  ;;  %s1100_s23 = int_to_ptr.vmem [resolvable:$true] %s1099_s23 }
 0x3f1   :  { %s1451_s0 = scalar_lea.vmem %s1100_s23, 256  ;;  %p1456_p1 = scmp.lt.s32.totalorder %s1100_s23, %s1100_s23 }
 0x3f2   :  { %p1452_p0 = scmp.ne.s32.totalorder %s1100_s23, %s1451_s0  ;;  %p1457_p2 = scmp.lt.s32.totalorder %s1451_s0, %s1451_s0 }
 0x3f3   :  { %v417_v49 = vpop.permute.xlu1 %416 }
 0x3f4   :  { %p1458_p3 = por %p1457_p2, %p1456_p1 }
 0x3f6   :  { %p1459_p4 = pnand %p1458_p3, %p1452_p0 }
 0x40e   :  { %613 = vmax.xlane.f32.xlu0 %v611_v45 }
 0x452   :  { %v616_v29 = vpop.xlane.xlu0 %615 }
 0x453   :  { %v618_v46 = vsub.f32 %v612_v3, %v616_v29 }
 0x455   :  { %v621_v31 = vmul.f32 1.442695, %v618_v46  ;;  %v1149_v46 = vld [vmem:[%s2075_s5] ss:$0 sm:$0xff] }
 0x456   :  { %v445_v30 = vpop.permute.xlu0 %444 }
 0x457   :  { %1435 = vpow2.f32 %v621_v31  ;;  %v477_v32 = vmul.f32 %v1781_v28, %v445_v30 }
 0x459   :  { %v732_v35 = vpack.c.bf16 %v477_v32, %v476_v33 }
 0x45a   :  { %v427_v34 = vpop.permute.xlu0 %426 }
 0x45b   :  { %755 = vrot.lane.b32.xlu1 %v732_v35, %s1475_s29  ;;  %v468_v28 = vmul.f32 %v427_v34, %v1758_v10 }
 0x45d   :  { %v728_v27 = vpack.c.bf16 %v469_v48, %v468_v28 }
 0x45e   :  { %v423_v47 = vpop.permute.xlu0 %422 }
 0x45f   :  { %753 = vrot.lane.b32.xlu1 %v731_v40, %s1475_s29  ;;  %v466_v40 = vmul.f32 %v423_v47, %v1754_v6 }
 0x462   :  { %v419_v25 = vpop.permute.xlu0 %418 }
 0x463   :  { %751 = vrot.lane.b32.xlu1 %v730_v22, %s1475_s29  ;;  %v727_v22 = vpack.c.bf16 %v467_v20, %v466_v40  ;;  %v464_v10 = vmul.f32 %v419_v25, %v1750_v4  ;;  %v1422_v25 = vld [vmem:[%s2077_s7] sm:$0xff]  }
 0x464   :  { %v1953_v58 = vpop.eup %1435 }
 0x465   :  { %1352 = vmatmul.mubr.f32.vlgmr.msra.gmra.mxu0 %v1953_v58  ;;  %v726_v14 = vpack.c.bf16 %v465_v9, %v464_v10 }
 0x466   :  { %v415_v37 = vpop.permute.xlu0 %414 }
 0x467   :  { %749 = vrot.lane.b32.xlu1 %v729_v17, %s1475_s29  ;;  %v462_v15 = vmul.f32 %v415_v37, %v1746_v63  ;;  %v463_v17 = vmul.f32 %v1744_v62, %v417_v49 }
 0x469   :  { %v725_v6 = vpack.c.bf16 %v463_v17, %v462_v15 }
 0x46b   :  { %747 = vrot.lane.b32.xlu1 %v728_v27, %s1475_s29 }
 0x46f   :  { %745 = vrot.lane.b32.xlu1 %v727_v22, %s1475_s29  ;;  %v1153_v22 = vld [vmem:[%s2076_s6] ss:$0 sm:$0xff] }
 0x473   :  { %743 = vrot.lane.b32.xlu1 %v726_v14, %s1475_s29 }
 0x477   :  { %741 = vrot.lane.b32.xlu1 %v725_v6, %s1475_s29  ;;  %v1424_v6 = vld [vmem:[%s2079_s9 + $0x30] sm:$0xff]  }
 0x497   :  { %v614_v5 = vpop.xlane.xlu0 %613 }
 0x498   :  { %v617_v50 = vsub.f32 %v611_v45, %v614_v5  ;;  %v1425_v5 = vld [vmem:[%s2079_s9 + $0x28] sm:$0xff]  }
 0x49a   :  { %v619_v38 = vmul.f32 1.442695, %v617_v50  ;;  %v1426_v50 = vld [vmem:[%s2079_s9 + $0x20] sm:$0xff]  }
 0x49c   :  { %1437 = vpow2.f32 %v619_v38  ;;  %v1427_v38 = vld [vmem:[%s2079_s9 + $0x18] sm:$0xff]  }
 0x4a9   :  { %v1438_v4 = vpop.eup %1437 }
 0x4aa   :  { %1351 = vmatprep.mubr.f32.mxu0 %v1438_v4 }
 0x4ab   :  { %1370 = vmatprep.mubr.msk.bf16.mxu0 %vm1474_vm1, %v1473_v7 }
 0x4cd   :  { %v756_v2 = vpop.permute.xlu1 %755 }
 0x4ce   :  { %1355 = vmatpush3.bf16.msra.mxu0 %v756_v2  ;;  %v1429_v2 = vld [vmem:[%s2079_s9 + $0x8] sm:$0xff]  }
 0x4cf   :  { %1356 = vmatprep.subr.bf16.mxu0 %v1473_v7 }
 0x4d1   :  { %v754_v63 = vpop.permute.xlu1 %753 }
 0x4d2   :  { %1357 = vmatpush3.bf16.msra.mxu0 %v754_v63  ;;  %v1430_v63 = vld [vmem:[%s2079_s9] sm:$0xff]  }
 0x4d3   :  { %1358 = vmatprep.subr.bf16.mxu0 %v1473_v7 }
 0x4d5   :  { %v752_v62 = vpop.permute.xlu1 %751 }
 0x4d6   :  { %1359 = vmatpush3.bf16.msra.mxu0 %v752_v62  ;;  %v1154_v62 = vld [vmem:[%s2078_s8] ss:$0 sm:$0xff] }
 0x4d7   :  { %1360 = vmatprep.subr.bf16.mxu0 %v1473_v7 }
 0x4d9   :  { %v750_v51 = vpop.permute.xlu1 %749 }
 0x4da   :  { %1361 = vmatpush3.bf16.msra.mxu0 %v750_v51 }
 0x4db   :  { %1362 = vmatprep.subr.bf16.mxu0 %v1473_v7 }
 0x4dd   :  { %v748_v39 = vpop.permute.xlu1 %747 }
 0x4de   :  { %1363 = vmatpush3.bf16.msra.mxu0 %v748_v39 }
 0x4df   :  { %1364 = vmatprep.subr.bf16.mxu0 %v1473_v7 }
 0x4e1   :  { %v746_v52 = vpop.permute.xlu1 %745 }
 0x4e2   :  { %1365 = vmatpush3.bf16.msra.mxu0 %v746_v52 }
 0x4e3   :  { %1366 = vmatprep.subr.bf16.mxu0 %v1473_v7 }
 0x4e5   :  { %v744_v53 = vpop.permute.xlu1 %743 }
 0x4e6   :  { %1367 = vmatpush3.bf16.msra.mxu0 %v744_v53 }
 0x4e7   :  { %1368 = vmatprep.subr.bf16.mxu0 %v1473_v7 }
 0x4e9   :  { %v742_v26 = vpop.permute.xlu1 %741 }
 0x4ea   :  { %1369 = vmatpush3.bf16.msra.mxu0 %v742_v26 }
 0x4eb   :  { %1374 = vmatprep.subr.bf16.mxu0 %v1473_v7 }
 0x525   :  { %v1353_v54 = vpop.f32.mrf.mxu0 }
 0x526   :  { %v711_v55 = vadd.f32 %v1353_v54, %v1894_v59  ;;  %v1419_v59 = vld [vmem:[%s2074_s4 + $0x8] sm:$0xff]  }
 0x527   :  { %v705_v56 = vpop.f32.mrf.mxu0 }
 0x528   :  { %1439 = vrcp.f32 %v711_v55  ;;  %v706_v57 = vadd.f32 %v705_v56, %v1938_v24 }
 0x52a   :  { %1441 = vrcp.f32 %v706_v57 }
 0x535   :  { %v1440_v60 = vpop.eup %1439 }
 0x536   :  { %v717_v61 = vmul.f32 %v1440_v60, %v711_v55 }
 0x537   :  { %v1442_v3 = vpop.eup %1441 }
 0x538   :  { %v719_v8 = vsub.f32 2.0, %v717_v61  ;;  %v716_v11 = vmul.f32 %v1442_v3, %v706_v57 }
 0x53a   :  { %v721_v12 = vmul.f32 %v1440_v60, %v719_v8  ;;  %v718_v13 = vsub.f32 2.0, %v716_v11 }
 0x53c   :  { %v720_v16 = vmul.f32 %v1442_v3, %v718_v13  ;;  %v723_v18 = vmul.f32 %v1953_v58, %v721_v12 }
 0x53e   :  { %v722_v21 = vmul.f32 %v1438_v4, %v720_v16  ;;  %v1428_v4 = vld [vmem:[%s2079_s9 + $0x10] sm:$0xff]   ;;  %v1158_v16 = vld [vmem:[%s2080_s10] ss:$0 sm:$0xff] }
 0x540   :  { %v724_v23 = vpack.c.bf16 %v723_v18, %v722_v21 }
 0x542   :  { %1371 = vmatmul.mubr.bf16.vlgmr.msra.gmra.mxu0 %v724_v23 }
 0x543   :  { %1378 = vmatprep.mubr.msk.bf16.mxu0 %vm1474_vm1, %v1473_v7  ;;  %1375 = vmatpush3.bf16.msra.mxu0 %v1419_v59 }
 0x544   :  { %1376 = vmatprep.subr.bf16.mxu0 %v1473_v7 }
 0x547   :  { %1377 = vmatpush3.bf16.msra.mxu0 %v1420_v41 }
 0x548   :  { %1382 = vmatprep.subr.bf16.mxu0 %v1473_v7 }
 0x602   :  { %v799_v24 = vpop.f32.mrf.mxu0 }
 0x604   :  { %v1372_v43 = vpop.f32.mrf.mxu0 }
 0x606   :  { %v802_v44 = vpop.f32.mrf.mxu0 }
 0x607   :  { %v806_v45 = vpack.c.bf16 %v802_v44, %v799_v24 }
 0x608   :  { %v1373_v29 = vpop.f32.mrf.mxu0 }
 0x609   :  { %1379 = vmatmul.mubr.msk.bf16.vlgmr.msra.gmra.mxu0 %vm56_vm0, %v806_v45 }
 0x60a   :  { %1386 = vmatprep.mubr.msk.bf16.mxu0 %vm1474_vm1, %v1473_v7 }
 0x6c9   :  { %v867_v31 = vpop.f32.mrf.mxu0 }
 0x6ca   :  { %v868_v30 = vadd.f32 %v1149_v46, %v867_v31 }
 0x6cb   :  { %v1380_v33 = vpop.f32.mrf.mxu0 }
 0x6cc   :  { %v2002_v32 = vadd.f32 %v868_v30, %v1563_v0  ;;  %v1421_v0 = vld [vmem:[%s2077_s7 + $0x8] sm:$0xff]  }
 0x6cd   :  { %v870_v35 = vpop.f32.mrf.mxu0  ;;  %1383 = vmatpush3.bf16.msra.mxu0 %v1421_v0 }
 0x6ce   :  { %v871_v34 = vadd.f32 %v1149_v46, %v870_v35  ;;  %v876_v36 = vmul.f32 %v2002_v32, %v2002_v32  ;;  %1384 = vmatprep.subr.bf16.mxu0 %v1473_v7  ;;  %v895_v37 = vmul.f32 %v1153_v22, %v2002_v32 }
 0x6cf   :  { %v1381_v47 = vpop.f32.mrf.mxu0 }
 0x6d0   :  { %v2007_v58 = vadd.f32 %v871_v34, %v1568_v1  ;;  %v878_v42 = vsel %vm56_vm0, %v876_v36, 0.0  ;;  %v1423_v1 = vld [vmem:[%s2079_s9 + $0x38] sm:$0xff]  }
 0x6d1   :  { %879 = vadd.xlane.f32.xlu0 %v878_v42  ;;  %1385 = vmatpush3.bf16.msra.mxu0 %v1422_v25 }
 0x6d2   :  { %v877_v28 = vmul.f32 %v2007_v58, %v2007_v58  ;;  %1391 = vmatpush3.bf16.msra.mxu1 %v1423_v1  ;;  %v896_v9 = vmul.f32 %v1153_v22, %v2007_v58 }
 0x6d3   :  { %1392 = vmatprep.subr.bf16.mxu1 %v1473_v7 }
 0x6d4   :  { %v881_v48 = vsel %vm56_vm0, %v877_v28, 0.0 }
 0x6d5   :  { %882 = vadd.xlane.f32.xlu1 %v881_v48 }
 0x6d6   :  { %1393 = vmatpush3.bf16.msra.mxu1 %v1424_v6 }
 0x6d7   :  { %1394 = vmatprep.subr.bf16.mxu1 %v1473_v7 }
 0x6da   :  { %1395 = vmatpush3.bf16.msra.mxu1 %v1425_v5 }
 0x6db   :  { %1396 = vmatprep.subr.bf16.mxu1 %v1473_v7 }
 0x6de   :  { %1397 = vmatpush3.bf16.msra.mxu1 %v1426_v50 }
 0x6df   :  { %1398 = vmatprep.subr.bf16.mxu1 %v1473_v7 }
 0x6e2   :  { %1399 = vmatpush3.bf16.msra.mxu1 %v1427_v38 }
 0x6e3   :  { %1400 = vmatprep.subr.bf16.mxu1 %v1473_v7 }
 0x6e6   :  { %1401 = vmatpush3.bf16.msra.mxu1 %v1428_v4 }
 0x6e7   :  { %1402 = vmatprep.subr.bf16.mxu1 %v1473_v7 }
 0x6ea   :  { %1403 = vmatpush3.bf16.msra.mxu1 %v1429_v2 }
 0x6eb   :  { %1404 = vmatprep.subr.bf16.mxu1 %v1473_v7 }
 0x6ee   :  { %1405 = vmatpush3.bf16.msra.mxu1 %v1430_v63 }
 0x75a   :  { %v880_v27 = vpop.xlane.xlu0 %879 }
 0x75b   :  { %v884_v40 = vadd.f32 1e-06, %v880_v27 }
 0x75d   :  { %1443 = vrsqrt.f32 %v884_v40 }
 0x75e   :  { %v883_v19 = vpop.xlane.xlu1 %882 }
 0x75f   :  { %v885_v20 = vadd.f32 1e-06, %v883_v19 }
 0x761   :  { %1445 = vrsqrt.f32 %v885_v20 }
 0x76a   :  { %v1444_v10 = vpop.eup %1443 }
 0x76b   :  { %v897_v14 = vmul.f32 %v1444_v10, %v895_v37 }
 0x76e   :  { %v1446_v49 = vpop.eup %1445 }
 0x76f   :  { %v898_v15 = vmul.f32 %v1446_v49, %v896_v9 }
 0x771   :  { %v899_v17 = vpack.c.bf16 %v898_v15, %v897_v14 }
 0x773   :  { %1387 = vmatmul.mubr.msk.bf16.vlgmr.msra.gmra.mxu0 %vm56_vm0, %v899_v17 }
 0x833   :  { %v960_v51 = vpop.f32.mrf.mxu0 }
 0x834   :  { %v961_v39 = vadd.f32 %v1154_v62, %v960_v51 }
 0x835   :  { %v1388_v52 = vpop.f32.mrf.mxu0 }
 0x836   :  { %v969_v53 = vmul.f32 0.70710677, %v961_v39  ;;  %v967_v61 = vmul.f32 0.5, %v961_v39 }
 0x837   :  { %v963_v26 = vpop.f32.mrf.mxu0 }
 0x838   :  { %1447 = verf.f32 %v969_v53  ;;  %v964_v54 = vadd.f32 %v1154_v62, %v963_v26 }
 0x839   :  { %v1389_v55 = vpop.f32.mrf.mxu0 }
 0x83a   :  { %v970_v56 = vmul.f32 0.70710677, %v964_v54  ;;  %v968_v3 = vmul.f32 0.5, %v964_v54 }
 0x83c   :  { %1449 = verf.f32 %v970_v56 }
 0x845   :  { %v1448_v7 = vpop.eup %1447 }
 0x846   :  { %v973_v57 = vadd.f32 1.0, %v1448_v7 }
 0x848   :  { %v975_v11 = vmul.f32 %v973_v57, %v967_v61 }
 0x849   :  { %v1450_v60 = vpop.eup %1449 }
 0x84a   :  { %v974_v8 = vadd.f32 1.0, %v1450_v60 }
 0x84c   :  { %v976_v12 = vmul.f32 %v974_v8, %v968_v3 }
 0x84e   :  { %v977_v13 = vpack.c.bf16 %v976_v12, %v975_v11 }
 0x850   :  { %1407 = vmatmul.mubr.bf16.vlgmr.msra.gmra.mxu1 %v977_v13 }
 0x910   :  { %v1083_v18 = vpop.f32.mrf.mxu1 }
 0x911   :  { %v1084_v21 = vadd.f32 %v1158_v16, %v1083_v18 }
 0x912   :  { %v1408_v23 = vpop.f32.mrf.mxu1 }
 0x913   :  { %v1090_v59 = vadd.f32 %v1084_v21, %v2002_v32 }
 0x914   :  { %v1086_v41 = vpop.f32.mrf.mxu1 }
 0x915   :  { %1092 = vst.msk [vmem:[#allocation2] sm:$0xff] %vm56_vm0, %v1090_v59  ;;  %v1087_v24 = vadd.f32 %v1158_v16, %v1086_v41 }
 0x916   :  { %v1409_v43 = vpop.f32.mrf.mxu1 }
 0x917   :  { %v1091_v44 = vadd.f32 %v1087_v24, %v2007_v58 }
 0x919   :  { %1093 = vst.msk [vmem:[#allocation2 + $0x8] sm:$0xff] %vm56_vm0, %v1091_v44 }
 0x91a   :  { %1462 = shalt.err (!%p1459_p4)
}
 0x91b   :  { %s1478_s10 = smov 128   ;;  %s1479_s4 = smov 8  }
 0x91c   :  { %1105 = dma.vmem_to_hbm [thread:$0]  %s1100_s23, 256, %s2085_s15, [#allocation3], %s1478_s10, %s1478_s10, %s1479_s4  }
 0x91d   :  { %1471 = dma.done.wait [#allocation3], 256  }
 0x91e   :  { %1472 = vsyncadd [#allocation3], 4294967040 }
 0x91f   :  { %1109 = vsyncpa [#allocation3], 1 }

</bundles_post_ra>
